<compile_context>
chip_gen: v7x
topology: tpu7x:2x2x1
jax: 0.10.0
libtpu: 0.0.40
codegen_flags: <defaults>
</compile_context>

<pallas_src>
import jax
import jax.numpy as jnp
from jax.experimental import pallas as pl
from jax.experimental.pallas import tpu as pltpu


def _round_up(x, m):
    return ((x + m - 1) // m) * m


# Packed-parameter layout: a single (48, 17) f32 buffer.
#   rows  0: 8, cols 0: 6  -> W1 (8, 6)     rows  0: 8, col 16 -> b1 (8,)
#   rows  8:24, cols 0: 8  -> W2 (16, 8)    rows  8:24, col 16 -> b2 (16,)
#   rows 24:48, cols 0:16  -> W3 (24, 16)   rows 24:48, col 16 -> b3 (24,)
# All row starts are multiples of 8 and all slices live in lane-tile 0, so the
# in-kernel static slices are cheap masked loads.
_P_ROWS, _P_COLS, _BIAS_COL = 48, 17, 16


def _base_pointnet_kernel(x_ref, p_ref, out_ref):
    # x_ref: (6, TILE_P) — channels on sublanes, points on lanes (lane-dense).
    x = x_ref[...]

    w1 = p_ref[0:8, 0:6]
    b1 = p_ref[0:8, _BIAS_COL:_BIAS_COL + 1]
    w2 = p_ref[8:24, 0:8]
    b2 = p_ref[8:24, _BIAS_COL:_BIAS_COL + 1]
    w3 = p_ref[24:48, 0:16]
    b3 = p_ref[24:48, _BIAS_COL:_BIAS_COL + 1]

    # conv1(6->8) + folded BN1 + ReLU
    h1 = jnp.maximum(
        jnp.dot(w1, x, preferred_element_type=jnp.float32) + b1, 0.0)
    # conv2(8->16) + folded BN2 + ReLU
    h2 = jnp.maximum(
        jnp.dot(w2, h1, preferred_element_type=jnp.float32) + b2, 0.0)
    # conv3(16->24) + folded BN3 + ReLU
    h3 = jnp.maximum(
        jnp.dot(w3, h2, preferred_element_type=jnp.float32) + b3, 0.0)

    # concat(coords[:4], features) along channels, then one XLU transpose so the
    # kernel writes the final (P, 28) channels-last layout directly (no wrapper
    # transpose / extra HBM pass).
    out_cp = jnp.concatenate([x[0:4, :], h3], axis=0)           # (28, TILE_P)
    out_ref[...] = jnp.transpose(out_cp, (1, 0)).astype(out_ref.dtype)


def pack_params(params):
    """Pack the six folded (W, b) arrays into one (48, 17) operand."""
    w1, b1, w2, b2, w3, b3 = params
    buf = jnp.zeros((_P_ROWS, _P_COLS), jnp.float32)
    buf = buf.at[0:8, 0:6].set(w1)
    buf = buf.at[0:8, _BIAS_COL].set(b1[:, 0])
    buf = buf.at[8:24, 0:8].set(w2)
    buf = buf.at[8:24, _BIAS_COL].set(b2[:, 0])
    buf = buf.at[24:48, 0:16].set(w3)
    buf = buf.at[24:48, _BIAS_COL].set(b3[:, 0])
    return buf


def base_pointnet_forward(in_mat, packed_params, *, max_tile_p=8192):
    """in_mat: (B, N, 6) float32. Returns (B, N, 28) float32."""
    B, N, C_in = in_mat.shape
    assert C_in == 6
    C_out = 28

    P = B * N
    # Lane-dense input layout for the kernel (single small wrapper transpose,
    # ~48 B/point; removing it too is lower priority than the output path).
    x_cp = in_mat.reshape(P, C_in).T                       # (6, P)

    if P < 128:
        tile_p = P                                         # single full block
    else:
        # Big tiles to amortize per-step overhead, but keep >= ~4 grid tiles
        # (when P allows) so v7x's two TensorCores both get work.
        tile_p = min(max_tile_p, _round_up(max(pl.cdiv(P, 4), 128), 128))
    grid = pl.cdiv(P, tile_p)                              # ragged last block OK

    out = pl.pallas_call(
        _base_pointnet_kernel,
        out_shape=jax.ShapeDtypeStruct((P, C_out), jnp.float32),
        grid_spec=pltpu.PrefetchScalarGridSpec(
            num_scalar_prefetch=0,
            grid=(grid,),
            in_specs=[
                pl.BlockSpec((C_in, tile_p), lambda p: (0, p)),      # point tile
                pl.BlockSpec(packed_params.shape, lambda p: (0, 0)),  # params
            ],
            out_specs=pl.BlockSpec((tile_p, C_out), lambda p: (p, 0)),
        ),
        compiler_params=pltpu.CompilerParams(
            dimension_semantics=("parallel",),      # shard point tiles on v7x
            vmem_limit_bytes=32 * 1024 * 1024),     # ~16 MiB used at tile=8192
    )(x_cp, packed_params)

    # (P, 28) -> (B, N, 28) is a free reshape (no data movement).
    return out.reshape(B, N, C_out)


def _make_params():
    """Deterministic synthetic parameters (PyTorch-shaped, then BN-folded).

    Returns W as (c_out, c_in) and b as (c_out, 1) so the kernel can compute
    relu(W @ X + b) directly in the lane-dense (C, P) layout.
    """
    def layer(key, c_in, c_out):
        kw, kb = jax.random.split(key)
        # Conv1d(k=1) weight (c_out, c_in, 1) -> (c_out, c_in); bias (c_out,)
        w = 0.2 * jax.random.normal(kw, (c_out, c_in), jnp.float32)
        b = 0.05 * jax.random.normal(kb, (c_out,), jnp.float32)
        # BatchNorm1d(c_out) in eval mode: deterministic, non-trivial stats.
        gamma = 1.0 + 0.05 * jnp.arange(c_out, dtype=jnp.float32)
        beta = 0.01 * jnp.arange(c_out, dtype=jnp.float32)
        r_mean = 0.02 * jnp.arange(c_out, dtype=jnp.float32)
        r_var = 1.0 + 0.03 * jnp.arange(c_out, dtype=jnp.float32)
        eps = 1e-5
        scale = gamma / jnp.sqrt(r_var + eps)            # (c_out,)
        shift = beta - r_mean * scale                    # (c_out,)
        # Fold BN into the 1x1 conv: y = (W x + b) * scale + shift
        w_folded = w * scale[:, None]                    # (c_out, c_in)
        b_folded = (b * scale + shift)[:, None]          # (c_out, 1)
        return w_folded, b_folded

    root = jax.random.PRNGKey(42)
    k1, k2, k3 = jax.random.split(root, 3)
    w1, b1 = layer(k1, 6, 8)
    w2, b2 = layer(k2, 8, 16)
    w3, b3 = layer(k3, 16, 24)
    return (w1, b1, w2, b2, w3, b3)


if __name__ == "__main__":
    B, N = 2, 16
    in_mat = jax.random.normal(jax.random.PRNGKey(0), (B, N, 6), jnp.float32)
    params = _make_params()
    packed = pack_params(params)

    out = jax.jit(base_pointnet_forward)(in_mat, packed)
    out = jax.block_until_ready(out)

    # Plain-JAX reference (same folded-BN semantics) for a sanity check.
    w1, b1, w2, b2, w3, b3 = params
    h = jnp.maximum(in_mat @ w1.T + b1[:, 0], 0.0)
    h = jnp.maximum(h @ w2.T + b2[:, 0], 0.0)
    h = jnp.maximum(h @ w3.T + b3[:, 0], 0.0)
    ref = jnp.concatenate([in_mat[:, :, :4], h], axis=-1)

    assert out.shape == (B, N, 28), out.shape
    assert jnp.allclose(out, ref, atol=1e-5, rtol=1e-5)
    print("KERNEL_OK")
</pallas_src>

<mosaic_0001>
module attributes {stable_mosaic.version = 11 : i64} {
  func.func @_base_pointnet_kernel(%arg0: i32, %arg1: memref<6x32xf32, #tpu.memory_space<vmem>>, %arg2: memref<48x17xf32, #tpu.memory_space<vmem>>, %arg3: memref<32x28xf32, #tpu.memory_space<vmem>>) attributes {dimension_semantics = [#tpu.dimension_semantics<parallel>], iteration_bounds = array<i64: 1>, scalar_prefetch = 0 : i64, scratch_operands = 0 : i64, tpu.core_type = #tpu.core_type<tc>, window_params = [{transform_indices = @transform_0, window_bounds = array<i64: 6, 32>}, {pipeline_mode = #tpu.pipeline_mode<synchronous>, transform_indices = @transform_1, window_bounds = array<i64: 48, 17>}, {transform_indices = @transform_2, window_bounds = array<i64: 32, 28>}]} {
    %c0 = arith.constant 0 : index
    %c0_0 = arith.constant 0 : index
    %0 = vector.load %arg1[%c0, %c0_0] : memref<6x32xf32, #tpu.memory_space<vmem>>, vector<6x32xf32>
    %c0_1 = arith.constant 0 : index
    %c0_2 = arith.constant 0 : index
    %1 = vector.load %arg2[%c0_1, %c0_2] : memref<48x17xf32, #tpu.memory_space<vmem>>, vector<8x6xf32>
    %c0_3 = arith.constant 0 : index
    %c16 = arith.constant 16 : index
    %2 = vector.load %arg2[%c0_3, %c16] : memref<48x17xf32, #tpu.memory_space<vmem>>, vector<8x1xf32>
    %c8 = arith.constant 8 : index
    %c0_4 = arith.constant 0 : index
    %3 = vector.load %arg2[%c8, %c0_4] : memref<48x17xf32, #tpu.memory_space<vmem>>, vector<16x8xf32>
    %c8_5 = arith.constant 8 : index
    %c16_6 = arith.constant 16 : index
    %4 = vector.load %arg2[%c8_5, %c16_6] : memref<48x17xf32, #tpu.memory_space<vmem>>, vector<16x1xf32>
    %c24 = arith.constant 24 : index
    %c0_7 = arith.constant 0 : index
    %5 = vector.load %arg2[%c24, %c0_7] : memref<48x17xf32, #tpu.memory_space<vmem>>, vector<24x16xf32>
    %c24_8 = arith.constant 24 : index
    %c16_9 = arith.constant 16 : index
    %6 = vector.load %arg2[%c24_8, %c16_9] : memref<48x17xf32, #tpu.memory_space<vmem>>, vector<24x1xf32>
    %cst = arith.constant dense<0.000000e+00> : vector<8x32xf32>
    %7 = tpu.matmul %1, %0, %cst {dimension_numbers = #tpu.dot_dimension_numbers<[1], [0], [0], [1], [0, 0, 1, 1], [], []>} : vector<8x6xf32>, vector<6x32xf32>, vector<8x32xf32> -> vector<8x32xf32>
    %8 = vector.broadcast %2 : vector<8x1xf32> to vector<8x32xf32>
    %9 = arith.addf %7, %8 : vector<8x32xf32>
    %cst_10 = arith.constant 0.000000e+00 : f32
    %10 = vector.broadcast %cst_10 : f32 to vector<8x32xf32>
    %11 = arith.maximumf %9, %10 : vector<8x32xf32>
    %cst_11 = arith.constant dense<0.000000e+00> : vector<16x32xf32>
    %12 = tpu.matmul %3, %11, %cst_11 {dimension_numbers = #tpu.dot_dimension_numbers<[1], [0], [0], [1], [0, 0, 1, 1], [], []>} : vector<16x8xf32>, vector<8x32xf32>, vector<16x32xf32> -> vector<16x32xf32>
    %13 = vector.broadcast %4 : vector<16x1xf32> to vector<16x32xf32>
    %14 = arith.addf %12, %13 : vector<16x32xf32>
    %cst_12 = arith.constant 0.000000e+00 : f32
    %15 = vector.broadcast %cst_12 : f32 to vector<16x32xf32>
    %16 = arith.maximumf %14, %15 : vector<16x32xf32>
    %cst_13 = arith.constant dense<0.000000e+00> : vector<24x32xf32>
    %17 = tpu.matmul %5, %16, %cst_13 {dimension_numbers = #tpu.dot_dimension_numbers<[1], [0], [0], [1], [0, 0, 1, 1], [], []>} : vector<24x16xf32>, vector<16x32xf32>, vector<24x32xf32> -> vector<24x32xf32>
    %18 = vector.broadcast %6 : vector<24x1xf32> to vector<24x32xf32>
    %19 = arith.addf %17, %18 : vector<24x32xf32>
    %cst_14 = arith.constant 0.000000e+00 : f32
    %20 = vector.broadcast %cst_14 : f32 to vector<24x32xf32>
    %21 = arith.maximumf %19, %20 : vector<24x32xf32>
    %22 = vector.extract_strided_slice %0 {offsets = [0, 0], sizes = [4, 32], strides = [1, 1]} : vector<6x32xf32> to vector<4x32xf32>
    %23 = tpu.concatenate %22, %21 in 0 : vector<4x32xf32>, vector<24x32xf32> -> vector<28x32xf32>
    %24 = tpu.transpose %23, [1, 0] : vector<28x32xf32> -> vector<32x28xf32>
    %c0_15 = arith.constant 0 : index
    %c0_16 = arith.constant 0 : index
    %25 = vector.load %arg3[%c0_15, %c0_16] : memref<32x28xf32, #tpu.memory_space<vmem>>, vector<32x28xf32>
    tpu.vector_store %arg3[%c0_15, %c0_16], %24 {strides = array<i32>} : memref<32x28xf32, #tpu.memory_space<vmem>>, vector<32x28xf32>,
    return
  }
  func.func @transform_0(%arg0: i32) -> (i32, i32) {
    %c0_i32 = arith.constant 0 : i32
    %c0_i32_0 = arith.constant 0 : i32
    return %c0_i32, %arg0 : i32, i32
  }
  func.func @transform_1(%arg0: i32) -> (i32, i32) {
    %c0_i32 = arith.constant 0 : i32
    %c0_i32_0 = arith.constant 0 : i32
    %c0_i32_1 = arith.constant 0 : i32
    return %c0_i32, %c0_i32_0 : i32, i32
  }
  func.func @transform_2(%arg0: i32) -> (i32, i32) {
    %c0_i32 = arith.constant 0 : i32
    %c0_i32_0 = arith.constant 0 : i32
    return %arg0, %c0_i32 : i32, i32
  }
}

</mosaic_0001>

<bundles_post_ra>
// kernel: base_pointnet_forward.1
= control target key start
LH: loop header
LB: loop body
LE: loop exit
PB: predicated region body
PF: predicated region fallthrough
CT: control target
= control target key end

     0   :  { %vm27_vm0 = vcmask 1045504   ;;  %v444_v2 = vmov 0.0   ;;  %vm445_vm1 = vmmov 0   ;;  %vm24_vm2 = vcmask 48128   ;;  %s507_s0 = inlined_call_operand.vmem [shape: f32[6,32], index: 0, kind: input, shape index: {}]   ;;  %s508_s1 = inlined_call_operand.vmem [shape: f32[48,17], index: 1, kind: input, shape index: {}]   ;;  %s509_s2 = inlined_call_operand.hbm [shape: f32[32,28], index: 2, kind: output, shape index: {}]  }
   0x1   :  { %v469_v0 = vld [vmem:[%s507_s0] sm:$0x3f]  ;;  %383 = vmatprep.subr.mxu0 %v444_v2  ;;  %385 = vmatprep.mubr.msk.f32.mxu0 %vm445_vm1, %v444_v2 }
   0x2   :  { %v13_v1 = vld [vmem:[%s508_s1] sm:$0xff] }
   0x3   :  { %7 = vsyncpa [#allocation3], 0  ;;  %384 = vmatpush3.msk.msra.mxu0 %vm27_vm0, %v469_v0  ;;  %v446_v3 = vmov 16   ;;  %v14_v4 = vld [vmem:[%s508_s1 + $0x8] sm:$0xff]  ;;  %v17_v5 = vld [vmem:[%s508_s1 + $0x20] sm:$0xff]  ;;  %vm112_vm3 = vcmask 64512  }
   0x4   :  { %418 = vset.pattern.permute.xlu0 %v446_v3  ;;  %386 = vmatmul.mubr.msk.f32.vlgmr.msra.gmra.mrb[0].mxu0 %vm24_vm2, %v13_v1  ;;  %v15_v6 = vld [vmem:[%s508_s1 + $0x10] sm:$0xff]  ;;  %v16_v7 = vld [vmem:[%s508_s1 + $0x18] sm:$0xff]  ;;  %v18_v8 = vld [vmem:[%s508_s1 + $0x28] sm:$0xff]  ;;  %v447_v14 = vmov 0.0|0.0   ;;  %vm209_vm4 = vcmask 130048   ;;  %vm302_vm5 = vcmask 1043456  }
   0x5   :  { %21 = vperm.xlu0 %418, %v13_v1   ;;  %419 = vset.pattern.permute.xlu1 %v446_v3  ;;  %vm345_vm6 = vcmask 228352   ;;  %s448_s1 = smov [#allocation2]  }
   0x6   :  { %397 = vmatprep.mubr.msk.f32.mxu0 %vm445_vm1, %v444_v2  ;;  %390 = vmatprep.mubr.msk.f32.mxu1 %vm112_vm3, %v14_v4  ;;  %s355_s22 = sshll.u32 %s448_s1, 4  ;;  %s356_s22 = int_to_ptr.vmem [resolvable:$true] %s355_s22 }
   0x7   :  { %109 = vperm.xlu1 %419, %v15_v6   ;;  %406 = vmatprep.subr.bf16.mxu0 %v447_v14  ;;  %s420_s23 = scalar_lea.vmem %s356_s22, 512  ;;  %p425_p1 = scmp.lt.s32.totalorder %s356_s22, %s356_s22 }
   0x8   :  { %p421_p0 = scmp.ne.s32.totalorder %s356_s22, %s420_s23  ;;  %p426_p2 = scmp.lt.s32.totalorder %s420_s23, %s420_s23 }
   0x9   :  { %104 = vperm.xlu0 %418, %v14_v4  }
   0xa   :  { %p427_p3 = por %p426_p2, %p425_p1 }
   0xb   :  { %196 = vperm.xlu1 %419, %v16_v7  }
   0xc   :  { %p428_p4 = pnand %p427_p3, %p421_p0 }
   0xd   :  { %201 = vperm.xlu0 %418, %v17_v5  }
   0xf   :  { %206 = vperm.xlu1 %419, %v18_v8  }
  0x84   :  { %v22_v9 = vpop.permute.xlu0 %21 }
  0x86   :  { %v110_v15 = vpop.permute.xlu1 %109 }
  0x88   :  { %v105_v17 = vpop.permute.xlu0 %104 }
  0x8a   :  { %v197_v24 = vpop.permute.xlu1 %196 }
  0x8c   :  { %v202_v25 = vpop.permute.xlu0 %201 }
  0x8e   :  { %v207_v34 = vpop.permute.xlu1 %206 }
  0xd7   :  { %v97_v10 = vpop.f32.mrb[0].mxu0 }
  0xd8   :  { %v98_v11 = vadd.f32 %v97_v10, %v22_v9  ;;  %v387_v12 = vpop.f32.mrb[1].mxu0 }
  0xda   :  { %v101_v13 = vmax.f32 %v98_v11, 0.0 }
  0xdc   :  { %388 = vmatprep.subr.mxu1 %v101_v13 }
  0xdd   :  { %389 = vmatpush3.msra.mxu1 %v101_v13 }
  0xde   :  { %391 = vmatmul.mubr.msk.f32.vlgmr.msra.gmra.mrb[0].mxu1 %vm112_vm3, %v15_v6  ;;  %409 = vmatprep.subr.bf16.mxu1 %v447_v14 }
  0xdf   :  { %400 = vmatprep.mubr.msk.f32.mxu1 %vm445_vm1, %v444_v2 }
 0x1b1   :  { %v392_v16 = vpop.f32.mrb[0].mxu1 }
 0x1b2   :  { %v189_v18 = vadd.f32 %v392_v16, %v110_v15  ;;  %v183_v19 = vpop.f32.mrb[1].mxu1 }
 0x1b3   :  { %v184_v20 = vadd.f32 %v183_v19, %v105_v17 }
 0x1b4   :  { %v193_v21 = vmax.f32 %v189_v18, 0.0 }
 0x1b5   :  { %v192_v22 = vmax.f32 %v184_v20, 0.0 }
 0x1b7   :  { %v407_v23 = vpack.c.bf16 %v193_v21, %v192_v22 }
 0x1b9   :  { %408 = vmatpush3.bf16.msra.mxu0 %v407_v23  ;;  %410 = vmatpush3.bf16.msra.mxu1 %v407_v23 }
 0x1bc   :  { %398 = vmatmul.mubr.msk.f32.vlgmr.msra.gmra.mrb[2].mxu0 %vm209_vm4, %v16_v7  ;;  %401 = vmatmul.mubr.msk.f32.vlgmr.msra.gmra.mrb[2].mxu1 %vm209_vm4, %v17_v5 }
 0x1bd   :  { %403 = vmatprep.mubr.msk.f32.mxu1 %vm445_vm1, %v444_v2 }
 0x1c0   :  { %404 = vmatmul.mubr.msk.f32.gmra.mrb[4].mxu1 %vm209_vm4, %v18_v8 }
 0x28f   :  { %v282_v26 = vpop.f32.mrb[2].mxu0  ;;  %v287_v27 = vpop.f32.mrb[2].mxu1 }
 0x290   :  { %v283_v28 = vadd.f32 %v282_v26, %v197_v24  ;;  %v288_v29 = vadd.f32 %v287_v27, %v202_v25  ;;  %v399_v30 = vpop.f32.mrb[3].mxu0  ;;  %v402_v31 = vpop.f32.mrb[3].mxu1 }
 0x292   :  { %v296_v32 = vmax.f32 %v283_v28, 0.0  ;;  %v297_v33 = vmax.f32 %v288_v29, 0.0 }
 0x293   :  { %v292_v35 = vpop.f32.mrb[4].mxu1 }
 0x294   :  { %v303_v36 = vrot.slane %v296_v32, 4  ;;  %v304_v37 = vrot.slane %v297_v33, 4  ;;  %v293_v38 = vadd.f32 %v292_v35, %v207_v34  ;;  %v405_v39 = vpop.f32.mrb[5].mxu1 }
 0x296   :  { %v298_v40 = vmax.f32 %v293_v38, 0.0  ;;  %v312_v41 = vsel %vm302_vm5, %v469_v0, %v303_v36  ;;  %v305_v42 = vsel %vm302_vm5, %v303_v36, %v304_v37 }
 0x297   :  { %313 = vxpose.xlu0.b32.start [1/4] (short) (narrow) %v312_v41, 32 }
 0x298   :  { %v306_v43 = vrot.slane %v298_v40, 4 }
 0x29a   :  { %v307_v44 = vsel %vm302_vm5, %v304_v37, %v306_v43 }
 0x29b   :  { %314 = vxpose.xlu0.b32.cont [2/4] (short) (narrow) %v305_v42, 32 }
 0x29f   :  { %315 = vxpose.xlu0.b32.cont [3/4] (short) (narrow) %v307_v44, 32 }
 0x2a3   :  { %316 = vxpose.xlu0.b32.end [4/4] (short) (narrow) %v306_v43, 32 }
 0x317   :  { %v329_v45 = vpop.trf.xlu0 }
 0x318   :  { %346 = vst.msk [vmem:[#allocation2] sm:$0xff] %vm345_vm6, %v329_v45 }
 0x31b   :  { %v330_v46 = vpop.trf.xlu0 }
 0x31c   :  { %347 = vst.msk [vmem:[#allocation2 + $0x8] sm:$0xff] %vm345_vm6, %v330_v46 }
 0x31f   :  { %v331_v47 = vpop.trf.xlu0 }
 0x320   :  { %348 = vst.msk [vmem:[#allocation2 + $0x10] sm:$0xff] %vm345_vm6, %v331_v47 }
 0x323   :  { %v332_v48 = vpop.trf.xlu0 }
 0x324   :  { %349 = vst.msk [vmem:[#allocation2 + $0x18] sm:$0xff] %vm345_vm6, %v332_v48 }
 0x325   :  { %431 = shalt.err (!%p428_p4)
}
 0x326   :  { %s432_s26 = scalar_lea.hbm %s509_s2, 512 }
 0x327   :  { %p433_p5 = scmp.ne.s32.totalorder %s509_s2, %s432_s26  ;;  %p436_p6 = scmp.lt.u32.totalorder %s432_s26, %s509_s2 }
 0x329   :  { %p438_p7 = pnand %p436_p6, %p433_p5 }
 0x32b   :  { %441 = shalt.err (!%p438_p7)
}
 0x32c   :  { %s449_s3 = smov 128   ;;  %s450_s4 = smov 8  }
 0x32d   :  { %361 = dma.vmem_to_hbm [thread:$0]  %s356_s22, 512, %s509_s2, [#allocation3], %s449_s3, %s449_s3, %s450_s4  }
 0x32e   :  { %442 = dma.done.wait [#allocation3], 512  }
 0x32f   :  { %443 = vsyncadd [#allocation3], 4294966784 }
 0x330   :  { %365 = vsyncpa [#allocation3], 1 }

</bundles_post_ra>
